<compile_context>
chip_gen: v6e
topology: v6e:2x2x1
jax: 0.10.0
libtpu: 0.0.40
codegen_flags: <defaults>
</compile_context>

<pallas_src>
import functools
import math

import jax
import jax.numpy as jnp
from jax.experimental import pallas as pl
from jax.experimental.pallas import tpu as pltpu

_EPS = 1e-5
_CPARAMS = pltpu.CompilerParams(
    dimension_semantics=("parallel",),        # v7x megacore splits the N tiles
    vmem_limit_bytes=32 * 1024 * 1024)


# ---------------------------------------------------------------------------
# Kernel bodies
# ---------------------------------------------------------------------------
def _matmul_stats_kernel(w_ref, x_ref, z_ref, stat_ref, *, c_out):
    """Layer 0: z = W @ x (channels-first) + packed per-tile BN partials."""
    z = jnp.dot(w_ref[...], x_ref[...], preferred_element_type=jnp.float32)
    z_ref[...] = z.astype(z_ref.dtype)                   # lane-dense bf16 store
    # Packed partial stats: rows [0:c_out] = sum(z), rows [c_out:2c_out] = sum(z^2).
    stat_ref[0, :c_out, :] = jnp.sum(z, axis=1, keepdims=True)
    stat_ref[0, c_out:, :] = jnp.sum(z * z, axis=1, keepdims=True)


def _bn_act_matmul_kernel(w_ref, z_ref, mean_ref, istd_ref, zo_ref, stat_ref,
                          *, c_out, apply_relu, mask_cols, n_valid):
    """Fused layer boundary i -> i+1: BN_i (+ReLU_i) applied in-register, then
    z_{i+1} = W_{i+1} @ y_i.  y_i never touches HBM."""
    y = (z_ref[...].astype(jnp.float32) - mean_ref[...]) * istd_ref[...]
    if apply_relu:
        y = jnp.maximum(y, 0.0)
    if mask_cols:
        # Keep padded columns exactly zero so the next layer's statistics and
        # values stay exact (padded z columns are zero, but BN would shift them).
        tn = z_ref.shape[1]
        col = pl.program_id(0) * tn + jax.lax.broadcasted_iota(
            jnp.int32, (1, tn), 1)
        y = jnp.where(col < n_valid, y, 0.0)
    z = jnp.dot(w_ref[...], y.astype(w_ref.dtype),
                preferred_element_type=jnp.float32)
    zo_ref[...] = z.astype(zo_ref.dtype)
    stat_ref[0, :c_out, :] = jnp.sum(z, axis=1, keepdims=True)
    stat_ref[0, c_out:, :] = jnp.sum(z * z, axis=1, keepdims=True)


def _bn_act_kernel(z_ref, mean_ref, istd_ref, o_ref, *, apply_relu):
    """Final layer: BN (+ReLU) only; padded columns are sliced off outside."""
    y = (z_ref[...].astype(jnp.float32) - mean_ref[...]) * istd_ref[...]
    if apply_relu:
        y = jnp.maximum(y, 0.0)
    o_ref[...] = y.astype(o_ref.dtype)


# ---------------------------------------------------------------------------
# Host-side helpers
# ---------------------------------------------------------------------------
def _col_tile(n):
    """Lane-axis (N) tile: always large.  Prefer exact divisors of the padded
    N (no padding waste) with an even tile count (v7x core balance); otherwise
    pad up to 2048-wide tiles (waste bounded by < 1 tile).  Never 128."""
    n128 = ((n + 127) // 128) * 128
    if n128 <= 2048:
        return n128                                  # single tile
    for t in (2048, 1024, 512):
        if n128 % t == 0 and (n128 // t) % 2 == 0:
            return t
    for t in (2048, 1024, 512):
        if n128 % t == 0:
            return t
    return 2048


def _stats_to_mean_istd(stats, c_out, n_valid, eps):
    """Tiny cross-tile reduce of packed partials -> (mean, inv_std), (C,1) f32."""
    tot = jnp.sum(stats, axis=0)                     # (2*c_out, 1)
    inv_n = 1.0 / n_valid
    mean = tot[:c_out] * inv_n
    ex2 = tot[c_out:] * inv_n
    # Single-pass E[z^2]-E[z]^2 in f32; clamped >= 0.  Fine here: activations
    # are BN-normalised / xavier-scaled so |mean| is not >> std.
    var = jnp.maximum(ex2 - mean * mean, 0.0)
    return mean, jax.lax.rsqrt(var + eps)


def _layer0_call(w, x_cf, *, tn, num_tiles):
    c_out, c_in = w.shape
    n_pad = num_tiles * tn
    cost = pl.CostEstimate(
        flops=2 * n_pad * c_in * c_out + 3 * n_pad * c_out,
        transcendentals=0,
        bytes_accessed=2 * (c_in * n_pad + c_in * c_out + c_out * n_pad)
        + 8 * num_tiles * c_out)
    # NOTE: if a profile shows exposed DMA at large tn, add
    # pipeline_mode=pl.Buffered(3) to the x in_spec / z out_spec.
    return pl.pallas_call(
        functools.partial(_matmul_stats_kernel, c_out=c_out),
        out_shape=(jax.ShapeDtypeStruct((c_out, n_pad), jnp.bfloat16),
                   jax.ShapeDtypeStruct((num_tiles, 2 * c_out, 1),
                                        jnp.float32)),
        grid_spec=pltpu.PrefetchScalarGridSpec(
            num_scalar_prefetch=0,
            grid=(num_tiles,),
            in_specs=[pl.BlockSpec((c_out, c_in), lambda i: (0, 0)),
                      pl.BlockSpec((c_in, tn), lambda i: (0, i))],
            out_specs=[pl.BlockSpec((c_out, tn), lambda i: (0, i)),
                       pl.BlockSpec((1, 2 * c_out, 1), lambda i: (i, 0, 0))]),
        compiler_params=_CPARAMS,
        cost_estimate=cost,
    )(w, x_cf)


def _fused_layer_call(w, z_in, mean, istd, *, tn, num_tiles, apply_relu,
                      mask_cols, n_valid):
    c_out, c_in = w.shape
    n_pad = num_tiles * tn
    cost = pl.CostEstimate(
        flops=2 * n_pad * c_in * c_out + n_pad * (3 * c_in + 3 * c_out),
        transcendentals=0,
        bytes_accessed=2 * (c_in * n_pad + c_in * c_out + c_out * n_pad)
        + 8 * (c_in + num_tiles * c_out))
    # Reuse the z_i buffer for z_{i+1} when shapes/dtypes match.
    alias = {1: 0} if c_in == c_out else {}
    return pl.pallas_call(
        functools.partial(_bn_act_matmul_kernel, c_out=c_out,
                          apply_relu=apply_relu, mask_cols=mask_cols,
                          n_valid=n_valid),
        out_shape=(jax.ShapeDtypeStruct((c_out, n_pad), jnp.bfloat16),
                   jax.ShapeDtypeStruct((num_tiles, 2 * c_out, 1),
                                        jnp.float32)),
        grid_spec=pltpu.PrefetchScalarGridSpec(
            num_scalar_prefetch=0,
            grid=(num_tiles,),
            in_specs=[pl.BlockSpec((c_out, c_in), lambda i: (0, 0)),
                      pl.BlockSpec((c_in, tn), lambda i: (0, i)),
                      pl.BlockSpec((c_in, 1), lambda i: (0, 0)),
                      pl.BlockSpec((c_in, 1), lambda i: (0, 0))],
            out_specs=[pl.BlockSpec((c_out, tn), lambda i: (0, i)),
                       pl.BlockSpec((1, 2 * c_out, 1), lambda i: (i, 0, 0))]),
        input_output_aliases=alias,
        compiler_params=_CPARAMS,
        cost_estimate=cost,
    )(w, z_in, mean, istd)


def _final_bn_call(z_in, mean, istd, *, tn, num_tiles, apply_relu, out_dtype):
    c_out, n_pad = z_in.shape
    cost = pl.CostEstimate(
        flops=3 * n_pad * c_out,
        transcendentals=0,
        bytes_accessed=(2 + jnp.dtype(out_dtype).itemsize) * c_out * n_pad
        + 8 * c_out)
    alias = {0: 0} if jnp.dtype(out_dtype) == z_in.dtype else {}
    return pl.pallas_call(
        functools.partial(_bn_act_kernel, apply_relu=apply_relu),
        out_shape=jax.ShapeDtypeStruct((c_out, n_pad), out_dtype),
        grid_spec=pltpu.PrefetchScalarGridSpec(
            num_scalar_prefetch=0,
            grid=(num_tiles,),
            in_specs=[pl.BlockSpec((c_out, tn), lambda i: (0, i)),
                      pl.BlockSpec((c_out, 1), lambda i: (0, 0)),
                      pl.BlockSpec((c_out, 1), lambda i: (0, 0))],
            out_specs=pl.BlockSpec((c_out, tn), lambda i: (0, i))),
        input_output_aliases=alias,
        compiler_params=_CPARAMS,
        cost_estimate=cost,
    )(z_in, mean, istd)


def fc_forward(x, params, activations, eps=_EPS):
    """FC forward.  x: (B, D1, D2, C_in) channels-last (as seen by the PyTorch
    module before its internal permutes).  Returns (B, D1, D2, C_out_last)."""
    b, d1, d2, c_in0 = x.shape
    n = b * d1 * d2
    tn = _col_tile(n)
    num_tiles = -(-n // tn)
    n_pad = num_tiles * tn
    padded = n_pad != n

    # Channels-first (C, N): the large N axis maps to lanes -> dense stores.
    # Cast to bf16 BEFORE the transpose so the transpose moves half the bytes.
    h = jnp.transpose(x.reshape(n, c_in0).astype(jnp.bfloat16))
    if padded:
        h = jnp.pad(h, ((0, 0), (0, n_pad - n)))     # zero cols: BN-stat safe

    # NOTE: the conv bias is intentionally NOT applied: a per-channel constant
    # shift is exactly removed by training-mode BatchNorm (gamma=1, beta=0),
    # so the forward output is unchanged (bias is zero-initialised anyway).
    w0 = params[0][0].astype(jnp.bfloat16)
    z, stats = _layer0_call(w0, h, tn=tn, num_tiles=num_tiles)
    mean, istd = _stats_to_mean_istd(stats, w0.shape[0], n, eps)

    # Fused layer boundaries: BN_i(+ReLU_i) + matmul_{i+1} in one pass over z_i.
    for li in range(1, len(params)):
        w = params[li][0].astype(jnp.bfloat16)
        z, stats = _fused_layer_call(
            w, z, mean, istd, tn=tn, num_tiles=num_tiles,
            apply_relu=(activations[li - 1] == "relu"),
            mask_cols=padded, n_valid=n)
        mean, istd = _stats_to_mean_istd(stats, w.shape[0], n, eps)

    y = _final_bn_call(z, mean, istd, tn=tn, num_tiles=num_tiles,
                       apply_relu=(activations[-1] == "relu"),
                       out_dtype=jnp.bfloat16)
    return jnp.transpose(y[:, :n]).reshape(b, d1, d2, -1).astype(x.dtype)


# ---------------------------------------------------------------------------
# Parameter init (matches conv2d_.__init__) and pure-JAX reference.
# ---------------------------------------------------------------------------
def init_fc_params(key, input_dims, units):
    """xavier_uniform weight (1x1 conv: fan_in=c_in, fan_out=c_out), zero bias."""
    params = []
    for c_in, c_out in zip(input_dims, units):
        key, sub = jax.random.split(key)
        bound = math.sqrt(6.0 / (c_in + c_out))
        w = jax.random.uniform(sub, (c_out, c_in), jnp.float32, -bound, bound)
        params.append((w, jnp.zeros((c_out,), jnp.float32)))
    return params


def fc_reference(x, params, activations, eps=_EPS):
    """Pure-JAX f32 reference of the PyTorch forward (training-mode BN)."""
    b, d1, d2, _ = x.shape
    h = x.reshape(b * d1 * d2, -1).astype(jnp.float32)
    for (w, bias), act in zip(params, activations):
        z = h @ w.T + bias
        mean = jnp.mean(z, axis=0)
        var = jnp.mean((z - mean) ** 2, axis=0)      # biased batch variance
        z = (z - mean) / jnp.sqrt(var + eps)
        if act == "relu":
            z = jnp.maximum(z, 0.0)
        h = z
    return h.reshape(b, d1, d2, -1)


if __name__ == "__main__":
    key = jax.random.PRNGKey(0)
    key, xk = jax.random.split(key)

    # Small shapes: batch=2, D1=16, D2=8, channels 4 -> 32 -> 16.
    B, D1, D2, C_IN = 2, 16, 8, 4
    input_dims = (C_IN, 32)
    units = (32, 16)
    activations = ("relu", None)   # mirrors FC(..., activations=(F.relu, None))

    x = jax.random.normal(xk, (B, D1, D2, C_IN), jnp.float32)
    params = init_fc_params(key, input_dims, units)

    fwd = jax.jit(lambda xx, pp: fc_forward(xx, pp, activations))
    out = jax.block_until_ready(fwd(x, params))
    assert out.shape == (B, D1, D2, units[-1])

    # Loose tolerance: bf16 matmul/activation path vs f32 reference (outputs
    # are ~unit scale after BN, so a layout/semantics bug shows up as O(1)).
    ref = fc_reference(x, params, activations)
    max_err = float(jnp.max(jnp.abs(out - ref)))
    assert max_err < 0.35, f"max abs error vs reference: {max_err}"
    print("KERNEL_OK")
</pallas_src>

<mosaic_0001>
module attributes {stable_mosaic.version = 11 : i64} {
  func.func @_bn_act_matmul_kernel(%arg0: i32, %arg1: memref<16x32xbf16, #tpu.memory_space<vmem>>, %arg2: memref<32x256xbf16, #tpu.memory_space<vmem>>, %arg3: memref<32x1xf32, #tpu.memory_space<vmem>>, %arg4: memref<32x1xf32, #tpu.memory_space<vmem>>, %arg5: memref<16x256xbf16, #tpu.memory_space<vmem>>, %arg6: memref<1x32x1xf32, #tpu.memory_space<vmem>>) attributes {dimension_semantics = [#tpu.dimension_semantics<parallel>], iteration_bounds = array<i64: 1>, scalar_prefetch = 0 : i64, scratch_operands = 0 : i64, tpu.core_type = #tpu.core_type<tc>, window_params = [{pipeline_mode = #tpu.pipeline_mode<synchronous>, transform_indices = @transform_0, window_bounds = array<i64: 16, 32>}, {transform_indices = @transform_1, window_bounds = array<i64: 32, 256>}, {pipeline_mode = #tpu.pipeline_mode<synchronous>, transform_indices = @transform_2, window_bounds = array<i64: 32, 1>}, {pipeline_mode = #tpu.pipeline_mode<synchronous>, transform_indices = @transform_3, window_bounds = array<i64: 32, 1>}, {transform_indices = @transform_4, window_bounds = array<i64: 16, 256>}, {transform_indices = @transform_5, window_bounds = array<i64: 1, 32, 1>}]} {
    %c0 = arith.constant 0 : index
    %c0_0 = arith.constant 0 : index
    %0 = vector.load %arg2[%c0, %c0_0] : memref<32x256xbf16, #tpu.memory_space<vmem>>, vector<32x256xbf16>
    %1 = arith.extf %0 : vector<32x256xbf16> to vector<32x256xf32>
    %c0_1 = arith.constant 0 : index
    %c0_2 = arith.constant 0 : index
    %2 = vector.load %arg3[%c0_1, %c0_2] : memref<32x1xf32, #tpu.memory_space<vmem>>, vector<32x1xf32>
    %3 = vector.broadcast %2 : vector<32x1xf32> to vector<32x256xf32>
    %4 = arith.subf %1, %3 : vector<32x256xf32>
    %c0_3 = arith.constant 0 : index
    %c0_4 = arith.constant 0 : index
    %5 = vector.load %arg4[%c0_3, %c0_4] : memref<32x1xf32, #tpu.memory_space<vmem>>, vector<32x1xf32>
    %6 = vector.broadcast %5 : vector<32x1xf32> to vector<32x256xf32>
    %7 = arith.mulf %4, %6 : vector<32x256xf32>
    %cst = arith.constant 0.000000e+00 : f32
    %8 = vector.broadcast %cst : f32 to vector<32x256xf32>
    %9 = arith.maximumf %7, %8 : vector<32x256xf32>
    %c0_5 = arith.constant 0 : index
    %c0_6 = arith.constant 0 : index
    %10 = vector.load %arg1[%c0_5, %c0_6] : memref<16x32xbf16, #tpu.memory_space<vmem>>, vector<16x32xbf16>
    %11 = arith.truncf %9 : vector<32x256xf32> to vector<32x256xbf16>
    %cst_7 = arith.constant dense<0.000000e+00> : vector<16x256xf32>
    %12 = tpu.matmul %10, %11, %cst_7 {dimension_numbers = #tpu.dot_dimension_numbers<[1], [0], [0], [1], [0, 0, 1, 1], [], []>} : vector<16x32xbf16>, vector<32x256xbf16>, vector<16x256xf32> -> vector<16x256xf32>
    %13 = arith.truncf %12 : vector<16x256xf32> to vector<16x256xbf16>
    %c0_8 = arith.constant 0 : index
    %c0_9 = arith.constant 0 : index
    %14 = vector.load %arg5[%c0_8, %c0_9] : memref<16x256xbf16, #tpu.memory_space<vmem>>, vector<16x256xbf16>
    tpu.vector_store %arg5[%c0_8, %c0_9], %13 {strides = array<i32>} : memref<16x256xbf16, #tpu.memory_space<vmem>>, vector<16x256xbf16>,
    %cst_10 = arith.constant dense<0.000000e+00> : vector<16xf32>
    %15 = vector.multi_reduction <add>, %12, %cst_10 [1] : vector<16x256xf32> to vector<16xf32>
    %16 = vector.shape_cast %15 : vector<16xf32> to vector<16x1xf32>
    %c0_11 = arith.constant 0 : index
    %c0_12 = arith.constant 0 : index
    %c0_13 = arith.constant 0 : index
    %17 = vector.load %arg6[%c0_11, %c0_12, %c0_13] : memref<1x32x1xf32, #tpu.memory_space<vmem>>, vector<1x16x1xf32>
    %18 = vector.shape_cast %17 : vector<1x16x1xf32> to vector<16x1xf32>
    %19 = vector.shape_cast %16 : vector<16x1xf32> to vector<1x16x1xf32>
    tpu.vector_store %arg6[%c0_11, %c0_12, %c0_13], %19 {strides = array<i32>} : memref<1x32x1xf32, #tpu.memory_space<vmem>>, vector<1x16x1xf32>,
    %20 = arith.mulf %12, %12 : vector<16x256xf32>
    %cst_14 = arith.constant dense<0.000000e+00> : vector<16xf32>
    %21 = vector.multi_reduction <add>, %20, %cst_14 [1] : vector<16x256xf32> to vector<16xf32>
    %22 = vector.shape_cast %21 : vector<16xf32> to vector<16x1xf32>
    %c0_15 = arith.constant 0 : index
    %c16 = arith.constant 16 : index
    %c0_16 = arith.constant 0 : index
    %23 = vector.load %arg6[%c0_15, %c16, %c0_16] : memref<1x32x1xf32, #tpu.memory_space<vmem>>, vector<1x16x1xf32>
    %24 = vector.shape_cast %23 : vector<1x16x1xf32> to vector<16x1xf32>
    %25 = vector.shape_cast %22 : vector<16x1xf32> to vector<1x16x1xf32>
    tpu.vector_store %arg6[%c0_15, %c16, %c0_16], %25 {strides = array<i32>} : memref<1x32x1xf32, #tpu.memory_space<vmem>>, vector<1x16x1xf32>,
    return
  }
  func.func @transform_0(%arg0: i32) -> (i32, i32) {
    %c0_i32 = arith.constant 0 : i32
    %c0_i32_0 = arith.constant 0 : i32
    %c0_i32_1 = arith.constant 0 : i32
    return %c0_i32, %c0_i32_0 : i32, i32
  }
  func.func @transform_1(%arg0: i32) -> (i32, i32) {
    %c0_i32 = arith.constant 0 : i32
    %c0_i32_0 = arith.constant 0 : i32
    return %c0_i32, %arg0 : i32, i32
  }
  func.func @transform_2(%arg0: i32) -> (i32, i32) {
    %c0_i32 = arith.constant 0 : i32
    %c0_i32_0 = arith.constant 0 : i32
    %c0_i32_1 = arith.constant 0 : i32
    return %c0_i32, %c0_i32_0 : i32, i32
  }
  func.func @transform_3(%arg0: i32) -> (i32, i32) {
    %c0_i32 = arith.constant 0 : i32
    %c0_i32_0 = arith.constant 0 : i32
    %c0_i32_1 = arith.constant 0 : i32
    return %c0_i32, %c0_i32_0 : i32, i32
  }
  func.func @transform_4(%arg0: i32) -> (i32, i32) {
    %c0_i32 = arith.constant 0 : i32
    %c0_i32_0 = arith.constant 0 : i32
    return %c0_i32, %arg0 : i32, i32
  }
  func.func @transform_5(%arg0: i32) -> (i32, i32, i32) {
    %c0_i32 = arith.constant 0 : i32
    %c0_i32_0 = arith.constant 0 : i32
    %c0_i32_1 = arith.constant 0 : i32
    return %arg0, %c0_i32, %c0_i32_0 : i32, i32, i32
  }
}

module attributes {stable_mosaic.version = 11 : i64} {
  func.func @_matmul_stats_kernel(%arg0: i32, %arg1: memref<32x4xbf16, #tpu.memory_space<vmem>>, %arg2: memref<4x256xbf16, #tpu.memory_space<vmem>>, %arg3: memref<32x256xbf16, #tpu.memory_space<vmem>>, %arg4: memref<1x64x1xf32, #tpu.memory_space<vmem>>) attributes {dimension_semantics = [#tpu.dimension_semantics<parallel>], iteration_bounds = array<i64: 1>, scalar_prefetch = 0 : i64, scratch_operands = 0 : i64, tpu.core_type = #tpu.core_type<tc>, window_params = [{pipeline_mode = #tpu.pipeline_mode<synchronous>, transform_indices = @transform_0, window_bounds = array<i64: 32, 4>}, {transform_indices = @transform_1, window_bounds = array<i64: 4, 256>}, {transform_indices = @transform_2, window_bounds = array<i64: 32, 256>}, {transform_indices = @transform_3, window_bounds = array<i64: 1, 64, 1>}]} {
    %c0 = arith.constant 0 : index
    %c0_0 = arith.constant 0 : index
    %0 = vector.load %arg1[%c0, %c0_0] : memref<32x4xbf16, #tpu.memory_space<vmem>>, vector<32x4xbf16>
    %c0_1 = arith.constant 0 : index
    %c0_2 = arith.constant 0 : index
    %1 = vector.load %arg2[%c0_1, %c0_2] : memref<4x256xbf16, #tpu.memory_space<vmem>>, vector<4x256xbf16>
    %cst = arith.constant dense<0.000000e+00> : vector<32x256xf32>
    %2 = tpu.matmul %0, %1, %cst {dimension_numbers = #tpu.dot_dimension_numbers<[1], [0], [0], [1], [0, 0, 1, 1], [], []>} : vector<32x4xbf16>, vector<4x256xbf16>, vector<32x256xf32> -> vector<32x256xf32>
    %3 = arith.truncf %2 : vector<32x256xf32> to vector<32x256xbf16>
    %c0_3 = arith.constant 0 : index
    %c0_4 = arith.constant 0 : index
    %4 = vector.load %arg3[%c0_3, %c0_4] : memref<32x256xbf16, #tpu.memory_space<vmem>>, vector<32x256xbf16>
    tpu.vector_store %arg3[%c0_3, %c0_4], %3 {strides = array<i32>} : memref<32x256xbf16, #tpu.memory_space<vmem>>, vector<32x256xbf16>,
    %cst_5 = arith.constant dense<0.000000e+00> : vector<32xf32>
    %5 = vector.multi_reduction <add>, %2, %cst_5 [1] : vector<32x256xf32> to vector<32xf32>
    %6 = vector.shape_cast %5 : vector<32xf32> to vector<32x1xf32>
    %c0_6 = arith.constant 0 : index
    %c0_7 = arith.constant 0 : index
    %c0_8 = arith.constant 0 : index
    %7 = vector.load %arg4[%c0_6, %c0_7, %c0_8] : memref<1x64x1xf32, #tpu.memory_space<vmem>>, vector<1x32x1xf32>
    %8 = vector.shape_cast %7 : vector<1x32x1xf32> to vector<32x1xf32>
    %9 = vector.shape_cast %6 : vector<32x1xf32> to vector<1x32x1xf32>
    tpu.vector_store %arg4[%c0_6, %c0_7, %c0_8], %9 {strides = array<i32>} : memref<1x64x1xf32, #tpu.memory_space<vmem>>, vector<1x32x1xf32>,
    %10 = arith.mulf %2, %2 : vector<32x256xf32>
    %cst_9 = arith.constant dense<0.000000e+00> : vector<32xf32>
    %11 = vector.multi_reduction <add>, %10, %cst_9 [1] : vector<32x256xf32> to vector<32xf32>
    %12 = vector.shape_cast %11 : vector<32xf32> to vector<32x1xf32>
    %c0_10 = arith.constant 0 : index
    %c32 = arith.constant 32 : index
    %c0_11 = arith.constant 0 : index
    %13 = vector.load %arg4[%c0_10, %c32, %c0_11] : memref<1x64x1xf32, #tpu.memory_space<vmem>>, vector<1x32x1xf32>
    %14 = vector.shape_cast %13 : vector<1x32x1xf32> to vector<32x1xf32>
    %15 = vector.shape_cast %12 : vector<32x1xf32> to vector<1x32x1xf32>
    tpu.vector_store %arg4[%c0_10, %c32, %c0_11], %15 {strides = array<i32>} : memref<1x64x1xf32, #tpu.memory_space<vmem>>, vector<1x32x1xf32>,
    return
  }
  func.func @transform_0(%arg0: i32) -> (i32, i32) {
    %c0_i32 = arith.constant 0 : i32
    %c0_i32_0 = arith.constant 0 : i32
    %c0_i32_1 = arith.constant 0 : i32
    return %c0_i32, %c0_i32_0 : i32, i32
  }
  func.func @transform_1(%arg0: i32) -> (i32, i32) {
    %c0_i32 = arith.constant 0 : i32
    %c0_i32_0 = arith.constant 0 : i32
    return %c0_i32, %arg0 : i32, i32
  }
  func.func @transform_2(%arg0: i32) -> (i32, i32) {
    %c0_i32 = arith.constant 0 : i32
    %c0_i32_0 = arith.constant 0 : i32
    return %c0_i32, %arg0 : i32, i32
  }
  func.func @transform_3(%arg0: i32) -> (i32, i32, i32) {
    %c0_i32 = arith.constant 0 : i32
    %c0_i32_0 = arith.constant 0 : i32
    %c0_i32_1 = arith.constant 0 : i32
    return %arg0, %c0_i32, %c0_i32_0 : i32, i32, i32
  }
}

module attributes {stable_mosaic.version = 11 : i64} {
  func.func @_bn_act_kernel(%arg0: i32, %arg1: memref<16x256xbf16, #tpu.memory_space<vmem>>, %arg2: memref<16x1xf32, #tpu.memory_space<vmem>>, %arg3: memref<16x1xf32, #tpu.memory_space<vmem>>, %arg4: memref<16x256xbf16, #tpu.memory_space<vmem>>) attributes {dimension_semantics = [#tpu.dimension_semantics<parallel>], iteration_bounds = array<i64: 1>, scalar_prefetch = 0 : i64, scratch_operands = 0 : i64, tpu.core_type = #tpu.core_type<tc>, window_params = [{transform_indices = @transform_0, window_bounds = array<i64: 16, 256>}, {pipeline_mode = #tpu.pipeline_mode<synchronous>, transform_indices = @transform_1, window_bounds = array<i64: 16, 1>}, {pipeline_mode = #tpu.pipeline_mode<synchronous>, transform_indices = @transform_2, window_bounds = array<i64: 16, 1>}, {transform_indices = @transform_3, window_bounds = array<i64: 16, 256>}]} {
    %c0 = arith.constant 0 : index
    %c0_0 = arith.constant 0 : index
    %0 = vector.load %arg1[%c0, %c0_0] : memref<16x256xbf16, #tpu.memory_space<vmem>>, vector<16x256xbf16>
    %1 = arith.extf %0 : vector<16x256xbf16> to vector<16x256xf32>
    %c0_1 = arith.constant 0 : index
    %c0_2 = arith.constant 0 : index
    %2 = vector.load %arg2[%c0_1, %c0_2] : memref<16x1xf32, #tpu.memory_space<vmem>>, vector<16x1xf32>
    %3 = vector.broadcast %2 : vector<16x1xf32> to vector<16x256xf32>
    %4 = arith.subf %1, %3 : vector<16x256xf32>
    %c0_3 = arith.constant 0 : index
    %c0_4 = arith.constant 0 : index
    %5 = vector.load %arg3[%c0_3, %c0_4] : memref<16x1xf32, #tpu.memory_space<vmem>>, vector<16x1xf32>
    %6 = vector.broadcast %5 : vector<16x1xf32> to vector<16x256xf32>
    %7 = arith.mulf %4, %6 : vector<16x256xf32>
    %8 = arith.truncf %7 : vector<16x256xf32> to vector<16x256xbf16>
    %c0_5 = arith.constant 0 : index
    %c0_6 = arith.constant 0 : index
    %9 = vector.load %arg4[%c0_5, %c0_6] : memref<16x256xbf16, #tpu.memory_space<vmem>>, vector<16x256xbf16>
    tpu.vector_store %arg4[%c0_5, %c0_6], %8 {strides = array<i32>} : memref<16x256xbf16, #tpu.memory_space<vmem>>, vector<16x256xbf16>,
    return
  }
  func.func @transform_0(%arg0: i32) -> (i32, i32) {
    %c0_i32 = arith.constant 0 : i32
    %c0_i32_0 = arith.constant 0 : i32
    return %c0_i32, %arg0 : i32, i32
  }
  func.func @transform_1(%arg0: i32) -> (i32, i32) {
    %c0_i32 = arith.constant 0 : i32
    %c0_i32_0 = arith.constant 0 : i32
    %c0_i32_1 = arith.constant 0 : i32
    return %c0_i32, %c0_i32_0 : i32, i32
  }
  func.func @transform_2(%arg0: i32) -> (i32, i32) {
    %c0_i32 = arith.constant 0 : i32
    %c0_i32_0 = arith.constant 0 : i32
    %c0_i32_1 = arith.constant 0 : i32
    return %c0_i32, %c0_i32_0 : i32, i32
  }
  func.func @transform_3(%arg0: i32) -> (i32, i32) {
    %c0_i32 = arith.constant 0 : i32
    %c0_i32_0 = arith.constant 0 : i32
    return %c0_i32, %arg0 : i32, i32
  }
}

</mosaic_0001>

<bundles_post_ra>
// kernel: _lambda_.5
= control target key start
LH: loop header
LB: loop body
LE: loop exit
PB: predicated region body
PF: predicated region fallthrough
CT: control target
= control target key end

     0   :  { %v77_v0 = vmov 0   ;;  %s122_s2 = inlined_call_operand.vmem [shape: f32[16,1], index: 2, kind: input, shape index: {}]   ;;  %s123_s1 = inlined_call_operand.vmem [shape: f32[16,1], index: 1, kind: input, shape index: {}]   ;;  %s124_s0 = inlined_call_operand.vmem [shape: bf16[16,256], index: 0, kind: input, shape index: {}, may-alias: {0,3}]   ;;  %s125_s3 = inlined_call_operand.vmem [shape: bf16[16,256], index: 3, kind: output, shape index: {}, may-alias: {0,3}]  }
   0x1   :  { %76 = vset.pattern.permute.xlu1 %v77_v0  ;;  %75 = vset.pattern.permute.xlu0 %v77_v0  ;;  %v36_v1 = vld [vmem:[%s122_s2] sm:$0xff]  ;;  %v37_v3 = vld [vmem:[%s122_s2 + $0x8] sm:$0xff] }
   0x2   :  { %v20_v2 = vld [vmem:[%s123_s1] sm:$0xff]  ;;  %40 = vperm.xlu1 %76, %v36_v1   ;;  %v21_v4 = vld [vmem:[%s123_s1 + $0x8] sm:$0xff] }
   0x3   :  { %24 = vperm.xlu0 %75, %v20_v2   ;;  %v14_v5 = vld [vmem:[%s124_s0] sm:$0xff]  ;;  %v15_v8 = vld [vmem:[%s124_s0 + $0x8] sm:$0xff] }
   0x4   :  { %v16_v6 = vunpack.c.l.bf16 %v14_v5  ;;  %v17_v7 = vunpack.c.h.bf16 %v14_v5  ;;  %v18_v13 = vunpack.c.l.bf16 %v15_v8  ;;  %v19_v14 = vunpack.c.h.bf16 %v15_v8 }
   0x6   :  { %45 = vperm.xlu1 %76, %v37_v3  }
   0x7   :  { %29 = vperm.xlu0 %75, %v21_v4  }
  0x7d   :  { %v41_v9 = vpop.permute.xlu1 %40 }
  0x7e   :  { %v25_v10 = vpop.permute.xlu0 %24 }
  0x7f   :  { %v32_v11 = vsub.f32 %v16_v6, %v25_v10  ;;  %v33_v12 = vsub.f32 %v17_v7, %v25_v10 }
  0x81   :  { %v48_v15 = vmul.f32 %v41_v9, %v32_v11  ;;  %v49_v16 = vmul.f32 %v41_v9, %v33_v12  ;;  %v46_v21 = vpop.permute.xlu1 %45 }
  0x82   :  { %v30_v17 = vpop.permute.xlu0 %29 }
  0x83   :  { %v72_v18 = vpack.c.bf16 %v49_v16, %v48_v15  ;;  %v34_v19 = vsub.f32 %v18_v13, %v30_v17  ;;  %v35_v20 = vsub.f32 %v19_v14, %v30_v17 }
  0x85   :  { %64 = vst [vmem:[%s125_s3] sm:$0xff] %v72_v18  ;;  %v50_v22 = vmul.f32 %v46_v21, %v34_v19  ;;  %v51_v23 = vmul.f32 %v46_v21, %v35_v20 }
  0x87   :  { %v73_v24 = vpack.c.bf16 %v51_v23, %v50_v22 }
  0x89   :  { %65 = vst [vmem:[%s125_s3 + $0x8] sm:$0xff] %v73_v24 }

// kernel: _lambda_.4
= control target key start
LH: loop header
LB: loop body
LE: loop exit
PB: predicated region body
PF: predicated region fallthrough
CT: control target
= control target key end

     0   :  { %v215_v0 = vmov 0   ;;  %vm115_vm0 = vcmask 261120   ;;  %vm182_vm1 = vcmask 7168   ;;  %s303_s3 = inlined_call_operand.vmem [shape: f32[32,1], index: 3, kind: input, shape index: {}]   ;;  %s304_s2 = inlined_call_operand.vmem [shape: f32[32,1], index: 2, kind: input, shape index: {}]   ;;  %s305_s0 = inlined_call_operand.vmem [shape: bf16[16,32], index: 0, kind: input, shape index: {}]   ;;  %s306_s1 = inlined_call_operand.vmem [shape: bf16[32,256], index: 1, kind: input, shape index: {}]   ;;  %s307_s4 = inlined_call_operand.vmem [shape: bf16[16,256], index: 4, kind: output, shape index: {0}]   ;;  %s308_s5 = inlined_call_operand.vmem [shape: f32[1,32,1], index: 5, kind: output, shape index: {1}]  }
   0x1   :  { %213 = vset.pattern.permute.xlu1 %v215_v0  ;;  %212 = vset.pattern.permute.xlu0 %v215_v0  ;;  %v66_v1 = vld [vmem:[%s303_s3 + $0x10] sm:$0xff]  ;;  %v67_v3 = vld [vmem:[%s303_s3 + $0x18] sm:$0xff]  ;;  %v33_v5 = vld [vmem:[%s304_s2 + $0x8] sm:$0xff] }
   0x2   :  { %v34_v2 = vld [vmem:[%s304_s2 + $0x10] sm:$0xff]  ;;  %80 = vperm.xlu1 %213, %v66_v1   ;;  %v35_v4 = vld [vmem:[%s304_s2 + $0x18] sm:$0xff]  ;;  %151 = vmatprep.mubr.bf16.mxu0 %v215_v0  ;;  %v32_v6 = vld [vmem:[%s304_s2] sm:$0xff] }
   0x3   :  { %48 = vperm.xlu0 %212, %v34_v2   ;;  %v65_v7 = vld [vmem:[%s303_s3 + $0x8] sm:$0xff]  ;;  %v64_v8 = vld [vmem:[%s303_s3] sm:$0xff]  ;;  %v22_v9 = vld [vmem:[%s306_s1 + $0x10] sm:$0xff] }
   0x4   :  { %v28_v10 = vunpack.c.l.bf16 %v22_v9  ;;  %v29_v11 = vunpack.c.h.bf16 %v22_v9  ;;  %v23_v12 = vld [vmem:[%s306_s1 + $0x18] sm:$0xff]  ;;  %v21_v19 = vld [vmem:[%s306_s1 + $0x8] sm:$0xff]  ;;  %v20_v22 = vld [vmem:[%s306_s1] sm:$0xff] }
   0x5   :  { %v30_v15 = vunpack.c.l.bf16 %v23_v12  ;;  %v31_v16 = vunpack.c.h.bf16 %v23_v12  ;;  %v26_v26 = vunpack.c.l.bf16 %v21_v19  ;;  %v27_v27 = vunpack.c.h.bf16 %v21_v19  ;;  %v214_v57 = vld [vmem:[%s305_s0] sm:$0xff]  }
   0x6   :  { %85 = vperm.xlu1 %213, %v67_v3   ;;  %v24_v30 = vunpack.c.l.bf16 %v20_v22  ;;  %v25_v31 = vunpack.c.h.bf16 %v20_v22 }
   0x7   :  { %53 = vperm.xlu0 %212, %v35_v4  }
   0xa   :  { %43 = vperm.xlu1 %213, %v33_v5  }
   0xb   :  { %38 = vperm.xlu0 %212, %v32_v6  }
   0xe   :  { %75 = vperm.xlu1 %213, %v65_v7  }
   0xf   :  { %70 = vperm.xlu0 %212, %v64_v8  }
  0x7d   :  { %v81_v13 = vpop.permute.xlu1 %80 }
  0x7e   :  { %v49_v14 = vpop.permute.xlu0 %48 }
  0x7f   :  { %v60_v17 = vsub.f32 %v28_v10, %v49_v14  ;;  %v61_v18 = vsub.f32 %v29_v11, %v49_v14 }
  0x81   :  { %v86_v20 = vpop.permute.xlu1 %85  ;;  %v92_v25 = vmul.f32 %v81_v13, %v60_v17  ;;  %v93_v28 = vmul.f32 %v81_v13, %v61_v18 }
  0x82   :  { %v54_v21 = vpop.permute.xlu0 %53 }
  0x83   :  { %v62_v23 = vsub.f32 %v30_v15, %v54_v21  ;;  %v63_v24 = vsub.f32 %v31_v16, %v54_v21  ;;  %v101_v35 = vmax.f32 %v93_v28, 0.0  ;;  %v100_v37 = vmax.f32 %v92_v25, 0.0 }
  0x85   :  { %v94_v29 = vmul.f32 %v86_v20, %v62_v23  ;;  %v95_v32 = vmul.f32 %v86_v20, %v63_v24  ;;  %v44_v33 = vpop.permute.xlu1 %43 }
  0x86   :  { %v39_v34 = vpop.permute.xlu0 %38  ;;  %v58_v39 = vsub.f32 %v26_v26, %v44_v33  ;;  %v59_v40 = vsub.f32 %v27_v27, %v44_v33 }
  0x87   :  { %v103_v36 = vmax.f32 %v95_v32, 0.0  ;;  %v102_v38 = vmax.f32 %v94_v29, 0.0  ;;  %v56_v41 = vsub.f32 %v24_v30, %v39_v34  ;;  %v57_v42 = vsub.f32 %v25_v31, %v39_v34 }
  0x89   :  { %v76_v43 = vpop.permute.xlu1 %75  ;;  %v109_v45 = vpack.c.bf16 %v103_v36, %v101_v35  ;;  %v108_v46 = vpack.c.bf16 %v102_v38, %v100_v37 }
  0x8a   :  { %v71_v44 = vpop.permute.xlu0 %70  ;;  %v90_v47 = vmul.f32 %v76_v43, %v58_v39  ;;  %v91_v48 = vmul.f32 %v76_v43, %v59_v40 }
  0x8b   :  { %v88_v49 = vmul.f32 %v71_v44, %v56_v41  ;;  %v89_v50 = vmul.f32 %v71_v44, %v57_v42  ;;  %131 = vmatprep.subr.bf16.mxu0 %v109_v45 }
  0x8c   :  { %v98_v51 = vmax.f32 %v90_v47, 0.0  ;;  %v99_v52 = vmax.f32 %v91_v48, 0.0  ;;  %132 = vmatpush1.bf16.msra.mxu0 %v108_v46 }
  0x8d   :  { %v96_v53 = vmax.f32 %v88_v49, 0.0  ;;  %v97_v54 = vmax.f32 %v89_v50, 0.0 }
  0x8f   :  { %v107_v55 = vpack.c.bf16 %v99_v52, %v97_v54  ;;  %v106_v56 = vpack.c.bf16 %v98_v51, %v96_v53 }
  0x91   :  { %133 = vmatprep.subr.bf16.mxu0 %v107_v55 }
  0x92   :  { %134 = vmatpush1.bf16.msra.mxu0 %v106_v56 }
  0x95   :  { %206 = vmatmul.mubr.msk.bf16.vlgmr.msra.gmra.mxu0 %vm115_vm0, %v214_v57 }
 0x155   :  { %v153_v58 = vpop.f32.mrf.mxu0 }
 0x156   :  { %v185_v0 = vmul.f32 %v153_v58, %v153_v58 }
 0x157   :  { %v155_v59 = vpop.f32.mrf.mxu0 }
 0x158   :  { %v209_v60 = vpack.c.bf16 %v155_v59, %v153_v58  ;;  %v176_v61 = vadd.f32 %v155_v59, %v153_v58  ;;  %v186_v62 = vmul.f32 %v155_v59, %v155_v59 }
 0x159   :  { %v157_v63 = vpop.f32.mrf.mxu0 }
 0x15a   :  { %177 = vadd.xlane.f32.xlu0 %v176_v61  ;;  %174 = vst [vmem:[%s307_s4] sm:$0xff] %v209_v60  ;;  %v189_v4 = vadd.f32 %v186_v62, %v185_v0  ;;  %v187_v6 = vmul.f32 %v157_v63, %v157_v63 }
 0x15b   :  { %v159_v1 = vpop.f32.mrf.mxu0 }
 0x15c   :  { %v210_v2 = vpack.c.bf16 %v159_v1, %v157_v63  ;;  %v188_v3 = vmul.f32 %v159_v1, %v159_v1  ;;  %v179_v5 = vadd.f32 %v159_v1, %v157_v63 }
 0x15e   :  { %175 = vst [vmem:[%s307_s4 + $0x8] sm:$0xff] %v210_v2  ;;  %190 = vadd.xlane.f32.xlu0 %v189_v4  ;;  %180 = vadd.xlane.f32.xlu1 %v179_v5  ;;  %v192_v7 = vadd.f32 %v188_v3, %v187_v6 }
 0x162   :  { %193 = vadd.xlane.f32.xlu0 %v192_v7 }
 0x1e3   :  { %v178_v8 = vpop.xlane.xlu0 %177 }
 0x1e4   :  { %183 = vst.msk [vmem:[%s308_s5] sm:$0xff] %vm182_vm1, %v178_v8 }
 0x1e7   :  { %v191_v9 = vpop.xlane.xlu0 %190  ;;  %v181_v10 = vpop.xlane.xlu1 %180 }
 0x1e8   :  { %195 = vst.msk [vmem:[%s308_s5 + $0x10] sm:$0xff] %vm182_vm1, %v191_v9  ;;  %184 = vst.msk [vmem:[%s308_s5 + $0x8] sm:$0xff] %vm182_vm1, %v181_v10 }
 0x1eb   :  { %v194_v11 = vpop.xlane.xlu0 %193 }
 0x1ec   :  { %196 = vst.msk [vmem:[%s308_s5 + $0x18] sm:$0xff] %vm182_vm1, %v194_v11 }

// kernel: _lambda_.3
= control target key start
LH: loop header
LB: loop body
LE: loop exit
PB: predicated region body
PF: predicated region fallthrough
CT: control target
= control target key end

     0   :  { %vm45_vm0 = vcmask 1041408   ;;  %v201_v1 = vmov 0   ;;  %vm38_vm1 = vcmask 31744   ;;  %vm145_vm2 = vcmask 7168   ;;  %s275_s1 = inlined_call_operand.vmem [shape: bf16[4,256], index: 1, kind: input, shape index: {}]   ;;  %s276_s0 = inlined_call_operand.vmem [shape: bf16[32,4], index: 0, kind: input, shape index: {}]   ;;  %s277_s2 = inlined_call_operand.vmem [shape: bf16[32,256], index: 2, kind: output, shape index: {0}]   ;;  %s278_s3 = inlined_call_operand.vmem [shape: f32[1,64,1], index: 3, kind: output, shape index: {1}]  }
   0x1   :  { %v184_v0 = vld.sshfl [vmem:[%s275_s1] sm:$0x33 pattern:$0x76325410]  ;;  %84 = vmatprep.mubr.bf16.mxu0 %v201_v1  ;;  %94 = vmatprep.mubr.bf16.mxu1 %v201_v1  ;;  %v200_v5 = vld [vmem:[%s276_s0 + $0x8] sm:$0xff]  }
   0x2   :  { %v37_v2 = vcombine.high %v184_v0, %v184_v0  ;;  %v47_v3 = vsel %vm45_vm0, %v184_v0, 0  ;;  %v199_v4 = vld [vmem:[%s276_s0] sm:$0xff]  }
   0x4   :  { %185 = vmatprep.subr.msk.bf16.mxu0 %vm45_vm0, %v37_v2  ;;  %196 = vmatprep.subr.msk.bf16.mxu1 %vm45_vm0, %v37_v2 }
   0x5   :  { %67 = vmatpush1.bf16.msra.mxu0 %v47_v3  ;;  %197 = vmatpush1.bf16.msra.mxu1 %v47_v3 }
   0x8   :  { %186 = vmatmul.mubr.msk.bf16.vlgmr.msra.gmra.mxu0 %vm38_vm1, %v199_v4  ;;  %187 = vmatmul.mubr.msk.bf16.vlgmr.msra.gmra.mxu1 %vm38_vm1, %v200_v5 }
  0xc8   :  { %v86_v6 = vpop.f32.mrf.mxu0  ;;  %v96_v7 = vpop.f32.mrf.mxu1 }
  0xc9   :  { %v150_v17 = vmul.f32 %v86_v6, %v86_v6  ;;  %v154_v30 = vmul.f32 %v96_v7, %v96_v7 }
  0xca   :  { %v88_v8 = vpop.f32.mrf.mxu0  ;;  %v98_v9 = vpop.f32.mrf.mxu1 }
  0xcb   :  { %v192_v10 = vpack.c.bf16 %v88_v8, %v86_v6  ;;  %v194_v11 = vpack.c.bf16 %v98_v9, %v96_v7  ;;  %v139_v12 = vadd.f32 %v98_v9, %v96_v7  ;;  %v133_v13 = vadd.f32 %v88_v8, %v86_v6 }
  0xcc   :  { %v90_v14 = vpop.f32.mrf.mxu0  ;;  %v100_v15 = vpop.f32.mrf.mxu1  ;;  %v151_v16 = vmul.f32 %v88_v8, %v88_v8  ;;  %v155_v27 = vmul.f32 %v98_v9, %v98_v9 }
  0xcd   :  { %129 = vst [vmem:[%s277_s2] sm:$0xff] %v192_v10  ;;  %131 = vst [vmem:[%s277_s2 + $0x10] sm:$0xff] %v194_v11  ;;  %140 = vadd.xlane.f32.xlu1 %v139_v12  ;;  %134 = vadd.xlane.f32.xlu0 %v133_v13  ;;  %v152_v25 = vmul.f32 %v90_v14, %v90_v14  ;;  %v156_v31 = vmul.f32 %v100_v15, %v100_v15 }
  0xce   :  { %v92_v18 = vpop.f32.mrf.mxu0  ;;  %v102_v19 = vpop.f32.mrf.mxu1  ;;  %v158_v22 = vadd.f32 %v151_v16, %v150_v17  ;;  %v164_v32 = vadd.f32 %v155_v27, %v154_v30 }
  0xcf   :  { %v193_v20 = vpack.c.bf16 %v92_v18, %v90_v14  ;;  %v195_v21 = vpack.c.bf16 %v102_v19, %v100_v15  ;;  %v153_v23 = vmul.f32 %v92_v18, %v92_v18  ;;  %v142_v24 = vadd.f32 %v102_v19, %v100_v15 }
  0xd0   :  { %v136_v26 = vadd.f32 %v92_v18, %v90_v14  ;;  %v157_v28 = vmul.f32 %v102_v19, %v102_v19 }
  0xd1   :  { %130 = vst [vmem:[%s277_s2 + $0x8] sm:$0xff] %v193_v20  ;;  %132 = vst [vmem:[%s277_s2 + $0x18] sm:$0xff] %v195_v21  ;;  %159 = vadd.xlane.f32.xlu0 %v158_v22  ;;  %143 = vadd.xlane.f32.xlu1 %v142_v24  ;;  %v161_v29 = vadd.f32 %v153_v23, %v152_v25 }
  0xd2   :  { %v167_v33 = vadd.f32 %v157_v28, %v156_v31 }
  0xd5   :  { %137 = vadd.xlane.f32.xlu0 %v136_v26  ;;  %162 = vadd.xlane.f32.xlu1 %v161_v29 }
  0xd9   :  { %165 = vadd.xlane.f32.xlu0 %v164_v32  ;;  %168 = vadd.xlane.f32.xlu1 %v167_v33 }
 0x156   :  { %v141_v34 = vpop.xlane.xlu1 %140  ;;  %v135_v35 = vpop.xlane.xlu0 %134 }
 0x157   :  { %148 = vst.msk [vmem:[%s278_s3 + $0x10] sm:$0xff] %vm145_vm2, %v141_v34  ;;  %146 = vst.msk [vmem:[%s278_s3] sm:$0xff] %vm145_vm2, %v135_v35 }
 0x15a   :  { %v160_v36 = vpop.xlane.xlu0 %159  ;;  %v144_v37 = vpop.xlane.xlu1 %143 }
 0x15b   :  { %170 = vst.msk [vmem:[%s278_s3 + $0x20] sm:$0xff] %vm145_vm2, %v160_v36  ;;  %149 = vst.msk [vmem:[%s278_s3 + $0x18] sm:$0xff] %vm145_vm2, %v144_v37 }
 0x15e   :  { %v138_v38 = vpop.xlane.xlu0 %137  ;;  %v163_v39 = vpop.xlane.xlu1 %162 }
 0x15f   :  { %147 = vst.msk [vmem:[%s278_s3 + $0x8] sm:$0xff] %vm145_vm2, %v138_v38  ;;  %171 = vst.msk [vmem:[%s278_s3 + $0x28] sm:$0xff] %vm145_vm2, %v163_v39 }
 0x162   :  { %v166_v40 = vpop.xlane.xlu0 %165  ;;  %v169_v41 = vpop.xlane.xlu1 %168 }
 0x163   :  { %172 = vst.msk [vmem:[%s278_s3 + $0x30] sm:$0xff] %vm145_vm2, %v166_v40  ;;  %173 = vst.msk [vmem:[%s278_s3 + $0x38] sm:$0xff] %vm145_vm2, %v169_v41 }

</bundles_post_ra>
